<compile_context>
chip_gen: v7x
topology: tpu7x:2x2x1
jax: 0.10.0
libtpu: 0.0.40
codegen_flags: <defaults>
</compile_context>

<pallas_src>
import math

import jax
import jax.numpy as jnp
from jax.experimental import pallas as pl
from jax.experimental.pallas import tpu as pltpu

_TWO_PI = 2.0 * math.pi
_HALF_PI = 0.5 * math.pi
_EPS = 1e-06
_TEMPERATURE = 10000.0


def _pos_embed_kernel(tab_ref, sel_ref, out_ref):
    """out[c, p] = sum_k table[c, k] * selector[k, p]  (one-hot -> broadcast on MXU)."""
    out_ref[...] = jnp.dot(
        tab_ref[...], sel_ref[...], preferred_element_type=jnp.float32
    )


def _round_up(n: int, m: int) -> int:
    return ((n + m - 1) // m) * m


def _pick_channel_tile(c2p: int) -> int:
    """Sublane-aligned (x8) channel tile; prefer >=2 blocks so both v7x TCs get work."""
    if c2p <= 8:
        return c2p
    t = min(128, c2p // 2)
    t -= t % 8
    return max(t, 8)


def _pick_spatial_tile(hw: int, k: int, c_tile: int) -> int:
    """128-lane-multiple spatial tile (or full HW) within a ~4 MiB per-block budget."""
    budget = 4 * 1024 * 1024  # selector + output block bytes, before double-buffering
    cap = 2048
    while cap > 128 and (k + c_tile) * cap * 4 > budget:
        cap //= 2
    return hw if hw <= cap else cap


def sinusoidal_position_embedding_2d(x: jax.Array, dimension: int) -> jax.Array:
    """Pallas equivalent of SinusoidalPositionEmbedding2d.forward.

    Args:
        x: (B, C, H, W) feature map (only its spatial shape is used).
        dimension: embedding dimension per axis (output has 2*dimension channels).
    Returns:
        (1, 2*dimension, H, W) float32 positional embedding.
    """
    _, _, H, W = x.shape
    C2 = 2 * dimension
    HW = H * W
    K = H + W

    # ---- tiny separable sin/cos table: dim*(H+W) transcendentals total --------
    d_half = (jnp.arange(dimension, dtype=jnp.int32) // 2).astype(jnp.float32)
    inv_freq = _TEMPERATURE ** (2.0 * d_half / float(dimension))           # (dim,)
    phase = (jnp.arange(dimension, dtype=jnp.float32) % 2.0) * _HALF_PI    # cos = sin(.+pi/2)
    y_norm = jnp.arange(1, H + 1, dtype=jnp.float32) / (float(H) + _EPS) * _TWO_PI
    x_norm = jnp.arange(1, W + 1, dtype=jnp.float32) / (float(W) + _EPS) * _TWO_PI
    pe_y = jnp.sin(y_norm[None, :] / inv_freq[:, None] + phase[:, None])   # (dim, H)
    pe_x = jnp.sin(x_norm[None, :] / inv_freq[:, None] + phase[:, None])   # (dim, W)
    table = jnp.concatenate(
        [
            jnp.concatenate([pe_y, jnp.zeros((dimension, W), jnp.float32)], axis=1),
            jnp.concatenate([jnp.zeros((dimension, H), jnp.float32), pe_x], axis=1),
        ],
        axis=0,
    )                                                                      # (C2, K)

    # ---- one-hot selector: column p activates its row index (y half) and its
    #      column index (x half); exactly one nonzero per half per column ------
    p = jnp.arange(HW, dtype=jnp.int32)
    hp = p // W
    wp = p - hp * W
    sel_y = (jnp.arange(H, dtype=jnp.int32)[:, None] == hp[None, :]).astype(jnp.float32)
    sel_x = (jnp.arange(W, dtype=jnp.int32)[:, None] == wp[None, :]).astype(jnp.float32)
    selector = jnp.concatenate([sel_y, sel_x], axis=0)                     # (K, HW)

    # ---- zero-pad channel (M) and contraction (K) dims to 8-aligned; exact ----
    C2p = _round_up(C2, 8)
    Kp = _round_up(K, 8)
    table = jnp.pad(table, ((0, C2p - C2), (0, Kp - K)))                   # (C2p, Kp)
    selector = jnp.pad(selector, ((0, Kp - K), (0, 0)))                    # (Kp, HW)

    # ---- tiling: lane-dense output, 8/128-aligned fixed tiles, cdiv grid ------
    c_tile = _pick_channel_tile(C2p)
    s_tile = _pick_spatial_tile(HW, Kp, c_tile)
    grid = (pl.cdiv(HW, s_tile), pl.cdiv(C2p, c_tile))  # spatial OUTER: selector block stays resident

    out = pl.pallas_call(
        _pos_embed_kernel,
        out_shape=jax.ShapeDtypeStruct((C2p, HW), jnp.float32),
        grid=grid,
        in_specs=[
            pl.BlockSpec((c_tile, Kp), lambda si, ci: (ci, 0)),
            pl.BlockSpec((Kp, s_tile), lambda si, ci: (0, si)),
        ],
        out_specs=pl.BlockSpec((c_tile, s_tile), lambda si, ci: (ci, si)),
        compiler_params=pltpu.CompilerParams(
            dimension_semantics=("parallel", "parallel"),
        ),
    )(table, selector)

    if C2p != C2:
        out = out[:C2]
    # (C2, HW) row-major == (C2, H, W) row-major; add the batch-1 axis.
    return out.reshape(C2, H, W)[None]


def _reference(x: jax.Array, dimension: int) -> jax.Array:
    """Pure-JAX transcription of the PyTorch forward, for validation."""
    _, _, H, W = x.shape
    not_mask = jnp.ones((1, H, W), jnp.float32)
    y_range = jnp.cumsum(not_mask, axis=1)
    x_range = jnp.cumsum(not_mask, axis=2)
    y_range = y_range / (y_range[:, -1:, :] + _EPS) * _TWO_PI
    x_range = x_range / (x_range[:, :, -1:] + _EPS) * _TWO_PI
    inv_freq = _TEMPERATURE ** (
        2.0 * (jnp.arange(dimension, dtype=jnp.float32) // 2) / dimension
    )
    x_range = x_range[..., None] / inv_freq
    y_range = y_range[..., None] / inv_freq
    pe_x = jnp.stack(
        (jnp.sin(x_range[..., 0::2]), jnp.cos(x_range[..., 1::2])), axis=-1
    ).reshape(1, H, W, dimension)
    pe_y = jnp.stack(
        (jnp.sin(y_range[..., 0::2]), jnp.cos(y_range[..., 1::2])), axis=-1
    ).reshape(1, H, W, dimension)
    return jnp.concatenate((pe_y, pe_x), axis=3).transpose(0, 3, 1, 2)


if __name__ == "__main__":
    key = jax.random.PRNGKey(0)

    # Small case matching the module convention (C == 2 * dimension).
    B, C, H, W = 2, 4, 16, 16
    dimension = 2
    x = jax.random.normal(key, (B, C, H, W), dtype=jnp.float32)
    out = jax.block_until_ready(sinusoidal_position_embedding_2d(x, dimension))
    assert out.shape == (1, 2 * dimension, H, W), out.shape
    assert out.dtype == jnp.float32
    ref = jax.block_until_ready(_reference(x, dimension))
    if not jnp.allclose(out, ref, rtol=1e-4, atol=1e-4):
        raise AssertionError("Pallas output does not match JAX reference (small case)")

    # Realistic ACT-style shape: 2 channel blocks, non-128-multiple HW (= 300).
    dim2, H2, W2 = 128, 15, 20
    x2 = jax.random.normal(key, (1, 2 * dim2, H2, W2), dtype=jnp.float32)
    out2 = jax.block_until_ready(sinusoidal_position_embedding_2d(x2, dim2))
    ref2 = jax.block_until_ready(_reference(x2, dim2))
    if not jnp.allclose(out2, ref2, rtol=1e-4, atol=1e-4):
        raise AssertionError("Pallas output does not match JAX reference (ACT case)")

    # Exercises the spatial cdiv grid with a ragged (masked) last block (HW = 2496).
    dim3, H3, W3 = 32, 48, 52
    x3 = jax.random.normal(key, (1, 2 * dim3, H3, W3), dtype=jnp.float32)
    out3 = jax.block_until_ready(sinusoidal_position_embedding_2d(x3, dim3))
    ref3 = jax.block_until_ready(_reference(x3, dim3))
    if not jnp.allclose(out3, ref3, rtol=1e-4, atol=1e-4):
        raise AssertionError("Pallas output does not match JAX reference (ragged case)")

    print("KERNEL_OK")
</pallas_src>

<mosaic_0001>
module attributes {stable_mosaic.version = 11 : i64} {
  func.func @_pos_embed_kernel(%arg0: i32, %arg1: i32, %arg2: memref<8x32xf32, #tpu.memory_space<vmem>>, %arg3: memref<32x256xf32, #tpu.memory_space<vmem>>, %arg4: memref<8x256xf32, #tpu.memory_space<vmem>>) attributes {dimension_semantics = [#tpu.dimension_semantics<parallel>, #tpu.dimension_semantics<parallel>], iteration_bounds = array<i64: 1, 1>, scalar_prefetch = 0 : i64, scratch_operands = 0 : i64, tpu.core_type = #tpu.core_type<tc>, window_params = [{transform_indices = @transform_0, window_bounds = array<i64: 8, 32>}, {transform_indices = @transform_1, window_bounds = array<i64: 32, 256>}, {transform_indices = @transform_2, window_bounds = array<i64: 8, 256>}]} {
    %c0 = arith.constant 0 : index
    %c0_0 = arith.constant 0 : index
    %0 = vector.load %arg2[%c0, %c0_0] : memref<8x32xf32, #tpu.memory_space<vmem>>, vector<8x32xf32>
    %c0_1 = arith.constant 0 : index
    %c0_2 = arith.constant 0 : index
    %1 = vector.load %arg3[%c0_1, %c0_2] : memref<32x256xf32, #tpu.memory_space<vmem>>, vector<32x256xf32>
    %cst = arith.constant dense<0.000000e+00> : vector<8x256xf32>
    %2 = tpu.matmul %0, %1, %cst {dimension_numbers = #tpu.dot_dimension_numbers<[1], [0], [0], [1], [0, 0, 1, 1], [], []>} : vector<8x32xf32>, vector<32x256xf32>, vector<8x256xf32> -> vector<8x256xf32>
    %c0_3 = arith.constant 0 : index
    %c0_4 = arith.constant 0 : index
    %3 = vector.load %arg4[%c0_3, %c0_4] : memref<8x256xf32, #tpu.memory_space<vmem>>, vector<8x256xf32>
    tpu.vector_store %arg4[%c0_3, %c0_4], %2 {strides = array<i32>} : memref<8x256xf32, #tpu.memory_space<vmem>>, vector<8x256xf32>,
    return
  }
  func.func @transform_0(%arg0: i32, %arg1: i32) -> (i32, i32) {
    %c0_i32 = arith.constant 0 : i32
    %c0_i32_0 = arith.constant 0 : i32
    return %arg1, %c0_i32 : i32, i32
  }
  func.func @transform_1(%arg0: i32, %arg1: i32) -> (i32, i32) {
    %c0_i32 = arith.constant 0 : i32
    %c0_i32_0 = arith.constant 0 : i32
    return %c0_i32, %arg0 : i32, i32
  }
  func.func @transform_2(%arg0: i32, %arg1: i32) -> (i32, i32) {
    %c0_i32 = arith.constant 0 : i32
    return %arg1, %arg0 : i32, i32
  }
}

</mosaic_0001>

<bundles_post_ra>
// kernel: tpu_custom_call.1
= control target key start
LH: loop header
LB: loop body
LE: loop exit
PB: predicated region body
PF: predicated region fallthrough
CT: control target
= control target key end

     0   :  { %7 = vsyncpa [#allocation3], 0  ;;  %s291_s0 = inlined_call_operand.hbm [shape: f32[8,32], index: 0, kind: input, shape index: {}]   ;;  %s292_s1 = inlined_call_operand.hbm [shape: f32[32,256], index: 1, kind: input, shape index: {}]   ;;  %s293_s2 = inlined_call_operand.hbm [shape: f32[8,256], index: 2, kind: output, shape index: {}]  }
   0x1   :  { %8 = vsyncpa [#allocation6], 0 }
   0x2   :  { %9 = vsyncpa [#allocation4], 0  ;;  %s227_s9 = smov [#allocation2]   ;;  %s228_s11 = smov [#allocation5]  }
   0x3   :  { %s16_s10 = sshll.u32 %s227_s9, 4  ;;  %s25_s12 = sshll.u32 %s228_s11, 4  ;;  %s17_s10 = int_to_ptr.vmem [resolvable:$true] %s16_s10  ;;  %s248_s12 = int_to_ptr.vmem [resolvable:$true] %s25_s12 }
   0x4   :  { %s155_s15 = scalar_lea.hbm %s291_s0, 128 }
   0x5   :  { %p156_p0 = scmp.ne.s32.totalorder %s291_s0, %s155_s15  ;;  %p159_p1 = scmp.lt.u32.totalorder %s155_s15, %s291_s0 }
   0x7   :  { %p161_p2 = pnand %p159_p1, %p156_p0 }
   0x9   :  { %164 = shalt.err (!%p161_p2)
}
   0xa   :  { %s165_s20 = scalar_lea.vmem %s17_s10, 128  ;;  %p170_p4 = scmp.lt.s32.totalorder %s17_s10, %s17_s10 }
   0xb   :  { %p166_p3 = scmp.ne.s32.totalorder %s17_s10, %s165_s20  ;;  %p171_p5 = scmp.lt.s32.totalorder %s165_s20, %s165_s20 }
   0xd   :  { %p172_p6 = por %p171_p5, %p170_p4 }
   0xf   :  { %p173_p7 = pnand %p172_p6, %p166_p3 }
  0x11   :  { %176 = shalt.err (!%p173_p7)
}
  0x12   :  { %19 = dma.hbm_to_vmem [thread:$0]  %s291_s0, 128, %s17_s10, [#allocation3]  }
  0x13   :  { %s177_s25 = scalar_lea.hbm %s292_s1, 1024 }
  0x14   :  { %p178_p8 = scmp.ne.s32.totalorder %s292_s1, %s177_s25  ;;  %p181_p9 = scmp.lt.u32.totalorder %s177_s25, %s292_s1 }
  0x16   :  { %p183_p10 = pnand %p181_p9, %p178_p8 }
  0x18   :  { %186 = shalt.err (!%p183_p10)
}
  0x19   :  { %s187_s30 = scalar_lea.vmem %s248_s12, 1024  ;;  %p192_p12 = scmp.lt.s32.totalorder %s248_s12, %s248_s12 }
  0x1a   :  { %p188_p11 = scmp.ne.s32.totalorder %s248_s12, %s187_s30  ;;  %p193_p13 = scmp.lt.s32.totalorder %s187_s30, %s187_s30 }
  0x1c   :  { %p194_p0 = por %p193_p13, %p192_p12 }
  0x1e   :  { %p195_p1 = pnand %p194_p0, %p188_p11 }
  0x20   :  { %198 = shalt.err (!%p195_p1)
}
  0x21   :  { %s229_s0 = smov 256   ;;  %s230_s3 = smov 16  }
  0x22   :  { %31 = dma.hbm_to_vmem [thread:$0]  %s292_s1, 1024, %s248_s12, [#allocation6], %s229_s0, %s229_s0, %s230_s3  }
  0x23   :  { %221 = dma.done.wait [#allocation3], 128  }
  0x24   :  { %222 = vsyncadd [#allocation3], 4294967168 }
  0x25   :  { %223 = dma.done.wait [#allocation6], 1024  }
  0x26   :  { %224 = vsyncadd [#allocation6], 4294966272  ;;  %v231_v0 = vmov 0.0   ;;  %v40_v1 = vld [vmem:[#allocation5 + $0x8] sm:$0xff]  ;;  %v42_v2 = vld [vmem:[#allocation5 + $0x18] sm:$0xff]  ;;  %vm47_vm0 = vcmask 261120  }
  0x27   :  { %115 = vmatprep.mubr.f32.mxu0 %v231_v0  ;;  %v39_v3 = vld [vmem:[#allocation5] sm:$0xff]  ;;  %v141_v4 = vpack.c.bf16 %v42_v2, %v40_v1  ;;  %v41_v5 = vld [vmem:[#allocation5 + $0x10] sm:$0xff]  ;;  %v44_v6 = vld [vmem:[#allocation5 + $0x28] sm:$0xff]  ;;  %s232_s1 = smov [#allocation7]  }
  0x28   :  { %v46_v7 = vld [vmem:[#allocation5 + $0x38] sm:$0xff]  ;;  %v143_v8 = vpack.c.bf16 %v41_v5, %v39_v3  ;;  %v43_v10 = vld [vmem:[#allocation5 + $0x20] sm:$0xff]  ;;  %v45_v11 = vld [vmem:[#allocation5 + $0x30] sm:$0xff]  ;;  %s130_s6 = sshll.u32 %s232_s1, 4  ;;  %s131_s6 = int_to_ptr.vmem [resolvable:$true] %s130_s6 }
  0x29   :  { %v145_v9 = vpack.c.bf16 %v46_v7, %v44_v6  ;;  %142 = vmatprep.subr.bf16.mxu0 %v141_v4  ;;  %v147_v12 = vpack.c.bf16 %v45_v11, %v43_v10  ;;  %v38_v13 = vld [vmem:[#allocation2] sm:$0xff]  ;;  %s199_s7 = scalar_lea.vmem %s131_s6, 256  ;;  %p204_p3 = scmp.lt.s32.totalorder %s131_s6, %s131_s6 }
  0x2a   :  { %144 = vmatpush1.bf16.msra.mxu0 %v143_v8  ;;  %p200_p2 = scmp.ne.s32.totalorder %s131_s6, %s199_s7  ;;  %p205_p4 = scmp.lt.s32.totalorder %s199_s7, %s199_s7 }
  0x2b   :  { %146 = vmatprep.subr.bf16.mxu0 %v145_v9 }
  0x2c   :  { %p206_p5 = por %p205_p4, %p204_p3 }
  0x2e   :  { %148 = vmatpush1.bf16.msra.mxu0 %v147_v12  ;;  %p207_p6 = pnand %p206_p5, %p200_p2 }
  0x31   :  { %140 = vmatmul.mubr.msk.f32.vlgmr.msra.gmra.mrb[0].mxu0 %vm47_vm0, %v38_v13 }
 0x104   :  { %v117_v14 = vpop.f32.mrb[0].mxu0 }
 0x105   :  { %122 = vst [vmem:[#allocation7] sm:$0xff] %v117_v14  ;;  %v119_v15 = vpop.f32.mrb[1].mxu0 }
 0x106   :  { %123 = vst [vmem:[#allocation7 + $0x8] sm:$0xff] %v119_v15 }
 0x107   :  { %210 = shalt.err (!%p207_p6)
}
 0x108   :  { %s211_s10 = scalar_lea.hbm %s293_s2, 256 }
 0x109   :  { %p212_p7 = scmp.ne.s32.totalorder %s293_s2, %s211_s10  ;;  %p215_p8 = scmp.lt.u32.totalorder %s211_s10, %s293_s2 }
 0x10b   :  { %p217_p9 = pnand %p215_p8, %p212_p7 }
 0x10d   :  { %220 = shalt.err (!%p217_p9)
}
 0x10e   :  { %133 = dma.vmem_to_hbm [thread:$0]  %s131_s6, 256, %s293_s2, [#allocation4]  }
 0x10f   :  { %225 = dma.done.wait [#allocation4], 256  }
 0x110   :  { %226 = vsyncadd [#allocation4], 4294967040 }
 0x111   :  { %137 = vsyncpa [#allocation3], 1 }
 0x112   :  { %138 = vsyncpa [#allocation6], 1 }
 0x113   :  { %139 = vsyncpa [#allocation4], 1 }

</bundles_post_ra>
